<compile_context>
chip_gen: v7x
topology: tpu7x:2x2x1
jax: 0.10.0
libtpu: 0.0.40
codegen_flags: <defaults>
</compile_context>

<pallas_src>
import jax
import jax.numpy as jnp
from jax.experimental import pallas as pl
from jax.experimental.pallas import tpu as pltpu


# ---------------------------------------------------------------------------
# Kernel
# ---------------------------------------------------------------------------
def _recommender_kernel(x_ref,            # (42, TB) bf16   fused [user|movie], batch on lanes
                        w1_ref, b1_ref,   # (64, 42) bf16, (64, 1) f32   block-diag layer 1
                        w2_ref, b2_ref,   # (16, 64) bf16, (16, 1) f32   layer-2 folded into predict[0]
                        pw2_ref, pb2_ref, # (1, 16)  bf16, (1, 1)  f32   predict[2]
                        out_ref):         # (1, TB)  f32
    x = x_ref[...]                                                     # bf16, fed straight to MXU

    # Fused user+movie layer 1 (block-diagonal) + ReLU: (64,42)@(42,TB)
    h1 = jnp.dot(w1_ref[...], x, preferred_element_type=jnp.float32) + b1_ref[...]
    h1 = jnp.maximum(h1, 0.0).astype(jnp.bfloat16)                     # (64, TB)

    # Folded [layer-2 ; predict[0]] + ReLU: (16,64)@(64,TB)
    ph = jnp.dot(w2_ref[...], h1, preferred_element_type=jnp.float32) + b2_ref[...]
    ph = jnp.maximum(ph, 0.0).astype(jnp.bfloat16)                     # (16, TB)

    # predict[2]: (1,16)@(16,TB) -> lane-dense (1, TB) output
    out_ref[...] = jnp.dot(pw2_ref[...], ph, preferred_element_type=jnp.float32) + pb2_ref[...]


# ---------------------------------------------------------------------------
# Host-side parameter fusion (block-diagonal towers + exact W2@pw1 fold)
# ---------------------------------------------------------------------------
def fuse_params(params):
    (uw1, ub1, uw2, ub2, mw1, mb1, mw2, mb2, pw1, pb1, pw2, pb2) = params

    # Layer 1: blockdiag(uw1, mw1) : (42, 64)
    w1 = jnp.zeros((42, 64), jnp.float32)
    w1 = w1.at[:20, :32].set(uw1).at[20:, 32:].set(mw1)
    b1 = jnp.concatenate([ub1, mb1], axis=-1)                 # (1, 64)

    # Layer 2: blockdiag(uw2, mw2) : (64, 32)
    w2 = jnp.zeros((64, 32), jnp.float32)
    w2 = w2.at[:32, :16].set(uw2).at[32:, 16:].set(mw2)
    b2 = jnp.concatenate([ub2, mb2], axis=-1)                 # (1, 32)

    # No ReLU between layer-2 and predict[0] -> fold is mathematically exact.
    w2p = w2 @ pw1                                            # (64, 16)
    bp = b2 @ pw1 + pb1                                       # (1, 16)

    # Feature-major (transposed) storage; weights bf16, biases f32 columns.
    return (
        w1.T.astype(jnp.bfloat16),    # (64, 42)
        b1.T,                         # (64, 1)
        w2p.T.astype(jnp.bfloat16),   # (16, 64)
        bp.T,                         # (16, 1)
        pw2.T.astype(jnp.bfloat16),   # (1, 16)
        pb2,                          # (1, 1)
    )


def _round_up(x, m):
    return (x + m - 1) // m * m


# ---------------------------------------------------------------------------
# Wrapper
# ---------------------------------------------------------------------------
def recommender_forward(user_input, movie_input, fused, *, tb=16384):
    """user_input: (B, 20) f32, movie_input: (B, 22) f32 -> (B,) f32."""
    B = user_input.shape[0]

    # Merge the two activation streams, transpose to feature-major and ship bf16.
    x = jnp.concatenate([user_input, movie_input], axis=-1)   # (B, 42)
    x = x.T.astype(jnp.bfloat16)                               # (42, B)

    # Lane-aligned batch tile: TB is a multiple of 128 (lane width) and clamped
    # to the padded batch so small batches stay a single small tile.  On v7x the
    # batch grid is sharded across both TensorCores when n_tiles >= 2.
    TB = _round_up(min(max(tb, 128), _round_up(B, 128)), 128)
    n_tiles = pl.cdiv(B, TB)
    Bp = n_tiles * TB
    if Bp != B:
        x = jnp.pad(x, ((0, 0), (0, Bp - B)))

    w1t, b1, w2t, bp, pw2t, pb2 = fused

    const2 = lambda i: (0, 0)          # weights/biases resident across all tiles
    in_specs = [
        pl.BlockSpec((42, TB), lambda i: (0, i)),   # activations (batch on lanes)
        pl.BlockSpec((64, 42), const2),             # w1^T
        pl.BlockSpec((64, 1), const2),              # b1
        pl.BlockSpec((16, 64), const2),             # (W2 @ pw1)^T
        pl.BlockSpec((16, 1), const2),              # b2 @ pw1 + pb1
        pl.BlockSpec((1, 16), const2),              # pw2^T
        pl.BlockSpec((1, 1), const2),               # pb2
    ]
    out_specs = pl.BlockSpec((1, TB), lambda i: (0, i))   # lane-dense output row

    out = pl.pallas_call(
        _recommender_kernel,
        out_shape=jax.ShapeDtypeStruct((1, Bp), jnp.float32),
        grid=(n_tiles,),
        in_specs=in_specs,
        out_specs=out_specs,
        compiler_params=pltpu.CompilerParams(
            dimension_semantics=("parallel",),       # megacore-shard batch on v7x
            vmem_limit_bytes=48 * 1024 * 1024,       # > v5e 16 MiB scoped default,
                                                     # < v7x 64 MiB physical
        ),
    )(x, w1t, b1, w2t, bp, pw2t, pb2)

    # torch: output.squeeze()  (row 0 of the (1, Bp) slab, trimmed to B)
    return out[0, :B]


# ---------------------------------------------------------------------------
# Deterministic PyTorch-Linear-style init (weights (in, out), biases (1, out))
# ---------------------------------------------------------------------------
def init_params(key):
    shapes = [
        (20, 32), (32,),   # user_branch[0]
        (32, 16), (16,),   # user_branch[2]
        (22, 32), (32,),   # movie_branch[0]
        (32, 16), (16,),   # movie_branch[2]
        (32, 16), (16,),   # predict_layer[0]
        (16, 1),  (1,),    # predict_layer[2]
    ]
    params = []
    keys = jax.random.split(key, len(shapes))
    current_fan_in = 1
    for k, shp in zip(keys, shapes):
        if len(shp) == 2:
            fan_in = shp[0]
            bound = 1.0 / jnp.sqrt(fan_in)
            params.append(jax.random.uniform(k, shp, jnp.float32, -bound, bound))
            current_fan_in = fan_in
        else:
            bound = 1.0 / jnp.sqrt(current_fan_in)
            params.append(jax.random.uniform(k, (1, shp[0]), jnp.float32, -bound, bound))
    return params


# ---------------------------------------------------------------------------
# References
# ---------------------------------------------------------------------------
def reference_forward_f32(user_input, movie_input, params):
    """Pure-f32 reference matching the original PyTorch module exactly."""
    (uw1, ub1, uw2, ub2, mw1, mb1, mw2, mb2, pw1, pb1, pw2, pb2) = params
    uv = jnp.maximum(user_input @ uw1 + ub1, 0.0) @ uw2 + ub2
    mv = jnp.maximum(movie_input @ mw1 + mb1, 0.0) @ mw2 + mb2
    c = jnp.concatenate([uv, mv], axis=-1)
    return jnp.squeeze(jnp.maximum(c @ pw1 + pb1, 0.0) @ pw2 + pb2, axis=-1)


def reference_forward_kernel_numerics(user_input, movie_input, fused):
    """Same bf16 rounding / fold as the kernel path, in plain jnp (tight check)."""
    w1t, b1, w2t, bp, pw2t, pb2 = fused
    x = jnp.concatenate([user_input, movie_input], axis=-1).astype(jnp.bfloat16).T
    h1 = jnp.maximum(jnp.dot(w1t, x, preferred_element_type=jnp.float32) + b1,
                     0.0).astype(jnp.bfloat16)
    ph = jnp.maximum(jnp.dot(w2t, h1, preferred_element_type=jnp.float32) + bp,
                     0.0).astype(jnp.bfloat16)
    out = jnp.dot(pw2t, ph, preferred_element_type=jnp.float32) + pb2
    return out[0]


if __name__ == "__main__":
    key = jax.random.PRNGKey(0)
    k_u, k_m, k_p = jax.random.split(key, 3)
    params = init_params(k_p)
    fused = fuse_params(params)

    # Small-batch check (single 128-wide tile, padded batch).
    B = 8
    user_input = jax.random.normal(k_u, (B, 20), jnp.float32)
    movie_input = jax.random.normal(k_m, (B, 22), jnp.float32)

    out = jax.block_until_ready(recommender_forward(user_input, movie_input, fused))
    assert out.shape == (B,)
    ref_bits = reference_forward_kernel_numerics(user_input, movie_input, fused)
    ref_f32 = reference_forward_f32(user_input, movie_input, params)
    assert jnp.allclose(out, ref_bits, atol=1e-3, rtol=1e-3)
    # bf16 weights/activations => parity with the f32 PyTorch model is ~bf16-level.
    assert jnp.allclose(out, ref_f32, atol=5e-2, rtol=5e-2)

    # Multi-tile check (exercises the batch grid, weight residency and padding).
    B2 = 300
    k_u2, k_m2 = jax.random.split(jax.random.PRNGKey(1), 2)
    user2 = jax.random.normal(k_u2, (B2, 20), jnp.float32)
    movie2 = jax.random.normal(k_m2, (B2, 22), jnp.float32)
    out2 = jax.block_until_ready(
        recommender_forward(user2, movie2, fused, tb=128))   # -> 3 grid tiles
    assert out2.shape == (B2,)
    ref2_bits = reference_forward_kernel_numerics(user2, movie2, fused)
    ref2_f32 = reference_forward_f32(user2, movie2, params)
    assert jnp.allclose(out2, ref2_bits, atol=1e-3, rtol=1e-3)
    assert jnp.allclose(out2, ref2_f32, atol=5e-2, rtol=5e-2)

    print("KERNEL_OK")
</pallas_src>

<mosaic_0001>
module attributes {stable_mosaic.version = 11 : i64} {
  func.func @_recommender_kernel(%arg0: i32, %arg1: memref<42x128xbf16, #tpu.memory_space<vmem>>, %arg2: memref<64x42xbf16, #tpu.memory_space<vmem>>, %arg3: memref<64x1xf32, #tpu.memory_space<vmem>>, %arg4: memref<16x64xbf16, #tpu.memory_space<vmem>>, %arg5: memref<16x1xf32, #tpu.memory_space<vmem>>, %arg6: memref<1x16xbf16, #tpu.memory_space<vmem>>, %arg7: memref<1x1xf32, #tpu.memory_space<vmem>>, %arg8: memref<1x128xf32, #tpu.memory_space<vmem>>) attributes {dimension_semantics = [#tpu.dimension_semantics<parallel>], iteration_bounds = array<i64: 1>, scalar_prefetch = 0 : i64, scratch_operands = 0 : i64, tpu.core_type = #tpu.core_type<tc>, window_params = [{transform_indices = @transform_0, window_bounds = array<i64: 42, 128>}, {pipeline_mode = #tpu.pipeline_mode<synchronous>, transform_indices = @transform_1, window_bounds = array<i64: 64, 42>}, {pipeline_mode = #tpu.pipeline_mode<synchronous>, transform_indices = @transform_2, window_bounds = array<i64: 64, 1>}, {pipeline_mode = #tpu.pipeline_mode<synchronous>, transform_indices = @transform_3, window_bounds = array<i64: 16, 64>}, {pipeline_mode = #tpu.pipeline_mode<synchronous>, transform_indices = @transform_4, window_bounds = array<i64: 16, 1>}, {pipeline_mode = #tpu.pipeline_mode<synchronous>, transform_indices = @transform_5, window_bounds = array<i64: 1, 16>}, {pipeline_mode = #tpu.pipeline_mode<synchronous>, transform_indices = @transform_6, window_bounds = array<i64: 1, 1>}, {transform_indices = @transform_7, window_bounds = array<i64: 1, 128>}]} {
    %c0 = arith.constant 0 : index
    %c0_0 = arith.constant 0 : index
    %0 = vector.load %arg1[%c0, %c0_0] : memref<42x128xbf16, #tpu.memory_space<vmem>>, vector<42x128xbf16>
    %c0_1 = arith.constant 0 : index
    %c0_2 = arith.constant 0 : index
    %1 = vector.load %arg2[%c0_1, %c0_2] : memref<64x42xbf16, #tpu.memory_space<vmem>>, vector<64x42xbf16>
    %cst = arith.constant dense<0.000000e+00> : vector<64x128xf32>
    %2 = tpu.matmul %1, %0, %cst {dimension_numbers = #tpu.dot_dimension_numbers<[1], [0], [0], [1], [0, 0, 1, 1], [], []>} : vector<64x42xbf16>, vector<42x128xbf16>, vector<64x128xf32> -> vector<64x128xf32>
    %c0_3 = arith.constant 0 : index
    %c0_4 = arith.constant 0 : index
    %3 = vector.load %arg3[%c0_3, %c0_4] : memref<64x1xf32, #tpu.memory_space<vmem>>, vector<64x1xf32>
    %4 = vector.broadcast %3 : vector<64x1xf32> to vector<64x128xf32>
    %5 = arith.addf %2, %4 : vector<64x128xf32>
    %cst_5 = arith.constant 0.000000e+00 : f32
    %6 = vector.broadcast %cst_5 : f32 to vector<64x128xf32>
    %7 = arith.maximumf %5, %6 : vector<64x128xf32>
    %8 = arith.truncf %7 : vector<64x128xf32> to vector<64x128xbf16>
    %c0_6 = arith.constant 0 : index
    %c0_7 = arith.constant 0 : index
    %9 = vector.load %arg4[%c0_6, %c0_7] : memref<16x64xbf16, #tpu.memory_space<vmem>>, vector<16x64xbf16>
    %cst_8 = arith.constant dense<0.000000e+00> : vector<16x128xf32>
    %10 = tpu.matmul %9, %8, %cst_8 {dimension_numbers = #tpu.dot_dimension_numbers<[1], [0], [0], [1], [0, 0, 1, 1], [], []>} : vector<16x64xbf16>, vector<64x128xbf16>, vector<16x128xf32> -> vector<16x128xf32>
    %c0_9 = arith.constant 0 : index
    %c0_10 = arith.constant 0 : index
    %11 = vector.load %arg5[%c0_9, %c0_10] : memref<16x1xf32, #tpu.memory_space<vmem>>, vector<16x1xf32>
    %12 = vector.broadcast %11 : vector<16x1xf32> to vector<16x128xf32>
    %13 = arith.addf %10, %12 : vector<16x128xf32>
    %cst_11 = arith.constant 0.000000e+00 : f32
    %14 = vector.broadcast %cst_11 : f32 to vector<16x128xf32>
    %15 = arith.maximumf %13, %14 : vector<16x128xf32>
    %16 = arith.truncf %15 : vector<16x128xf32> to vector<16x128xbf16>
    %c0_12 = arith.constant 0 : index
    %c0_13 = arith.constant 0 : index
    %17 = vector.load %arg6[%c0_12, %c0_13] : memref<1x16xbf16, #tpu.memory_space<vmem>>, vector<1x16xbf16>
    %cst_14 = arith.constant dense<0.000000e+00> : vector<1x128xf32>
    %18 = tpu.matmul %17, %16, %cst_14 {dimension_numbers = #tpu.dot_dimension_numbers<[1], [0], [0], [1], [0, 0, 1, 1], [], []>} : vector<1x16xbf16>, vector<16x128xbf16>, vector<1x128xf32> -> vector<1x128xf32>
    %c0_15 = arith.constant 0 : index
    %c0_16 = arith.constant 0 : index
    %19 = vector.load %arg7[%c0_15, %c0_16] : memref<1x1xf32, #tpu.memory_space<vmem>>, vector<1x1xf32>
    %20 = vector.broadcast %19 : vector<1x1xf32> to vector<1x128xf32>
    %21 = arith.addf %18, %20 : vector<1x128xf32>
    %c0_17 = arith.constant 0 : index
    %c0_18 = arith.constant 0 : index
    %22 = vector.load %arg8[%c0_17, %c0_18] : memref<1x128xf32, #tpu.memory_space<vmem>>, vector<1x128xf32>
    tpu.vector_store %arg8[%c0_17, %c0_18], %21 {strides = array<i32>} : memref<1x128xf32, #tpu.memory_space<vmem>>, vector<1x128xf32>,
    return
  }
  func.func @transform_0(%arg0: i32) -> (i32, i32) {
    %c0_i32 = arith.constant 0 : i32
    %c0_i32_0 = arith.constant 0 : i32
    return %c0_i32, %arg0 : i32, i32
  }
  func.func @transform_1(%arg0: i32) -> (i32, i32) {
    %c0_i32 = arith.constant 0 : i32
    %c0_i32_0 = arith.constant 0 : i32
    %c0_i32_1 = arith.constant 0 : i32
    return %c0_i32, %c0_i32_0 : i32, i32
  }
  func.func @transform_2(%arg0: i32) -> (i32, i32) {
    %c0_i32 = arith.constant 0 : i32
    %c0_i32_0 = arith.constant 0 : i32
    %c0_i32_1 = arith.constant 0 : i32
    return %c0_i32, %c0_i32_0 : i32, i32
  }
  func.func @transform_3(%arg0: i32) -> (i32, i32) {
    %c0_i32 = arith.constant 0 : i32
    %c0_i32_0 = arith.constant 0 : i32
    %c0_i32_1 = arith.constant 0 : i32
    return %c0_i32, %c0_i32_0 : i32, i32
  }
  func.func @transform_4(%arg0: i32) -> (i32, i32) {
    %c0_i32 = arith.constant 0 : i32
    %c0_i32_0 = arith.constant 0 : i32
    %c0_i32_1 = arith.constant 0 : i32
    return %c0_i32, %c0_i32_0 : i32, i32
  }
  func.func @transform_5(%arg0: i32) -> (i32, i32) {
    %c0_i32 = arith.constant 0 : i32
    %c0_i32_0 = arith.constant 0 : i32
    %c0_i32_1 = arith.constant 0 : i32
    return %c0_i32, %c0_i32_0 : i32, i32
  }
  func.func @transform_6(%arg0: i32) -> (i32, i32) {
    %c0_i32 = arith.constant 0 : i32
    %c0_i32_0 = arith.constant 0 : i32
    %c0_i32_1 = arith.constant 0 : i32
    return %c0_i32, %c0_i32_0 : i32, i32
  }
  func.func @transform_7(%arg0: i32) -> (i32, i32) {
    %c0_i32 = arith.constant 0 : i32
    %c0_i32_0 = arith.constant 0 : i32
    return %c0_i32, %arg0 : i32, i32
  }
}

</mosaic_0001>

<bundles_post_ra>
// kernel: tpu_custom_call.1
= control target key start
LH: loop header
LB: loop body
LE: loop exit
PB: predicated region body
PF: predicated region fallthrough
CT: control target
= control target key end

     0   :  { %s581_s0 = inlined_call_operand.vmem [shape: bf16[42,128], index: 0, kind: input, shape index: {}]   ;;  %s582_s1 = inlined_call_operand.vmem [shape: bf16[64,42], index: 1, kind: input, shape index: {}]   ;;  %s583_s2 = inlined_call_operand.vmem [shape: f32[64,1], index: 2, kind: input, shape index: {}]   ;;  %s584_s3 = inlined_call_operand.vmem [shape: bf16[16,64], index: 3, kind: input, shape index: {}]   ;;  %s585_s4 = inlined_call_operand.vmem [shape: f32[16,1], index: 4, kind: input, shape index: {}]   ;;  %s586_s5 = inlined_call_operand.vmem [shape: bf16[1,16], index: 5, kind: input, shape index: {}]   ;;  %s587_s6 = inlined_call_operand.<no memory space> [shape: f32[1,1], index: 6, kind: input, shape index: {}]   ;;  %s588_s7 = inlined_call_operand.hbm [shape: f32[1,128], index: 7, kind: output, shape index: {}]  }
   0x1   :  { %v12_v0 = vstv %s587_s6 }
   0x2   :  { %13 = vst [vmem:[#allocation2] sm:$0x1] %v12_v0 }
   0x3   :  { %v427_v1 = vld [vmem:[%s581_s0] sm:$0xff]   ;;  %v428_v2 = vld [vmem:[%s581_s0 + $0x8] sm:$0xff]   ;;  %vm129_vm0 = vcmask 343040   ;;  %v429_v4 = vld [vmem:[%s581_s0 + $0x10] sm:$0x1f]   ;;  %v459_v5 = vmov 0  }
   0x4   :  { %388 = vmatprep.subr.bf16.mxu0 %v427_v1  ;;  %v430_v3 = vld [vmem:[%s582_s1] sm:$0xff]   ;;  %425 = vset.pattern.permute.xlu0 %v459_v5  ;;  %vm142_vm1 = vcmask 1044480   ;;  %v46_v7 = vld [vmem:[%s583_s2 + $0x10] sm:$0xff]  ;;  %v45_v9 = vld [vmem:[%s583_s2 + $0x8] sm:$0xff] }
   0x5   :  { %389 = vmatpush3.bf16.msra.mxu0 %v427_v1  ;;  %394 = vmatprep.mubr.msk.bf16.mxu0 %vm129_vm0, %v430_v3  ;;  %v44_v6 = vld [vmem:[%s583_s2] sm:$0xff]  ;;  %v144_v8 = vsel %vm142_vm1, %v429_v4, 0  ;;  %v431_v10 = vld [vmem:[%s582_s1 + $0x8] sm:$0xff]   ;;  %v47_v11 = vld [vmem:[%s583_s2 + $0x18] sm:$0xff] }
   0x6   :  { %390 = vmatprep.subr.bf16.mxu0 %v428_v2  ;;  %426 = vset.pattern.permute.xlu1 %v459_v5  ;;  %v432_v12 = vld [vmem:[%s582_s1 + $0x10] sm:$0xff]  }
   0x7   :  { %54 = vperm.xlu0 %425, %v44_v6   ;;  %64 = vperm.xlu1 %426, %v46_v7  }
   0x9   :  { %391 = vmatpush3.bf16.msra.mxu0 %v428_v2 }
   0xa   :  { %420 = vmatprep.subr.msk.bf16.mxu0 %vm142_vm1, %v429_v4 }
   0xd   :  { %393 = vmatpush3.bf16.msra.mxu0 %v144_v8 }
   0xe   :  { %14 = vsyncpa [#allocation4], 0  ;;  %59 = vperm.xlu0 %425, %v45_v9   ;;  %v48_v13 = vld [vmem:[%s583_s2 + $0x20] sm:$0xff]  ;;  %69 = vperm.xlu1 %426, %v47_v11   ;;  %v49_v14 = vld [vmem:[%s583_s2 + $0x28] sm:$0xff]  ;;  %v460_v21 = vmov 0.0   ;;  %vm461_vm2 = vmmov 0   ;;  %v297_v7 = vlaneseq }
   0xf   :  { %v50_v15 = vld [vmem:[%s583_s2 + $0x30] sm:$0xff]  ;;  %v433_v16 = vld [vmem:[%s582_s1 + $0x18] sm:$0xff]   ;;  %v225_v18 = vld [vmem:[%s585_s4] sm:$0xff]  ;;  %402 = vmatprep.subr.bf16.mxu1 %v460_v21  ;;  %410 = vmatprep.mubr.msk.bf16.mxu1 %vm461_vm2, %v460_v21  ;;  %vm242_vm3 = vcmask 523264   ;;  %vm301_vm4 = vcmask 130048   ;;  %s462_s11 = smov [#allocation3]  }
  0x10   :  { %395 = vmatmul.mubr.msk.bf16.vlgmr.msra.gmra.mrb[0].mxu0 %vm129_vm0, %v431_v10  ;;  %v51_v17 = vld [vmem:[%s583_s2 + $0x38] sm:$0xff]  ;;  %v226_v19 = vld [vmem:[%s585_s4 + $0x8] sm:$0xff]  ;;  %v291_v20 = vld [vmem:[#allocation2] sm:$0x1]  ;;  %v298_v8 = vshrl.u32 %v297_v7, 7  ;;  %s352_s12 = sshll.u32 %s462_s11, 4  ;;  %s353_s12 = int_to_ptr.vmem [resolvable:$true] %s352_s12 }
  0x11   :  { %398 = vmatprep.mubr.msk.bf16.mxu0 %vm129_vm0, %v432_v12  ;;  %v434_v58 = vld [vmem:[%s584_s3] sm:$0xff]   ;;  %s435_s13 = scalar_lea.vmem %s353_s12, 16  ;;  %s439_s14 = scalar_lea.vmem %s353_s12, 32 }
  0x12   :  { %74 = vperm.xlu0 %425, %v48_v13   ;;  %79 = vperm.xlu1 %426, %v49_v14   ;;  %v290_v6 = vld [vmem:[%s586_s5] sm:$0x1]  ;;  %v299_v9 = vsub.s32 0, %v298_v8  ;;  %p436_p0 = scmp.ne.s32.totalorder %s353_s12, %s435_s13  ;;  %p440_p1 = scmp.lt.s32.totalorder %s353_s12, %s353_s12 }
  0x13   :  { %p441_p2 = scmp.lt.s32.totalorder %s439_s14, %s435_s13 }
  0x15   :  { %p442_p3 = por %p441_p2, %p440_p1 }
  0x16   :  { %84 = vperm.xlu0 %425, %v50_v15   ;;  %89 = vperm.xlu1 %426, %v51_v17  }
  0x17   :  { %p443_p4 = pnand %p442_p3, %p436_p0 }
  0x18   :  { %399 = vmatmul.mubr.msk.bf16.gmra.mrb[4].mxu0 %vm129_vm0, %v433_v16 }
  0x1a   :  { %229 = vperm.xlu0 %425, %v225_v18   ;;  %234 = vperm.xlu1 %426, %v226_v19  }
  0x1e   :  { %294 = vperm.xlu0 %425, %v291_v20  }
  0x86   :  { %v55_v22 = vpop.permute.xlu0 %54  ;;  %v65_v23 = vpop.permute.xlu1 %64 }
  0x8d   :  { %v60_v24 = vpop.permute.xlu0 %59  ;;  %v70_v25 = vpop.permute.xlu1 %69 }
  0x91   :  { %v75_v29 = vpop.permute.xlu0 %74  ;;  %v80_v34 = vpop.permute.xlu1 %79 }
  0x95   :  { %v85_v41 = vpop.permute.xlu0 %84  ;;  %v90_v46 = vpop.permute.xlu1 %89 }
  0x99   :  { %v230_v59 = vpop.permute.xlu0 %229  ;;  %v235_v63 = vpop.permute.xlu1 %234 }
  0x9d   :  { %v295_v10 = vpop.permute.xlu0 %294 }
  0x9e   :  { %v300_v11 = vrot.slane %v295_v10, %v299_v9 }
  0xe3   :  { %v396_v26 = vpop.f32.mrb[0].mxu0 }
  0xe4   :  { %v189_v27 = vadd.f32 %v396_v26, %v65_v23  ;;  %v180_v28 = vpop.f32.mrb[1].mxu0 }
  0xe5   :  { %v181_v30 = vadd.f32 %v180_v28, %v55_v22  ;;  %v397_v31 = vpop.f32.mrb[2].mxu0 }
  0xe6   :  { %v192_v32 = vadd.f32 %v397_v31, %v70_v25  ;;  %v183_v33 = vpop.f32.mrb[3].mxu0  ;;  %v213_v36 = vmax.f32 %v189_v27, 0.0 }
  0xe7   :  { %v184_v35 = vadd.f32 %v183_v33, %v60_v24  ;;  %v211_v38 = vmax.f32 %v181_v30, 0.0 }
  0xe8   :  { %v214_v37 = vmax.f32 %v192_v32, 0.0 }
  0xe9   :  { %v212_v39 = vmax.f32 %v184_v35, 0.0 }
  0xea   :  { %v220_v40 = vpack.c.bf16 %v214_v37, %v213_v36 }
  0xeb   :  { %v400_v42 = vpop.f32.mrb[4].mxu0  ;;  %v219_v43 = vpack.c.bf16 %v212_v39, %v211_v38 }
  0xec   :  { %v205_v44 = vadd.f32 %v400_v42, %v85_v41  ;;  %v196_v45 = vpop.f32.mrb[5].mxu0 }
  0xed   :  { %v197_v47 = vadd.f32 %v196_v45, %v75_v29  ;;  %v401_v48 = vpop.f32.mrb[6].mxu0  ;;  %403 = vmatpush3.bf16.msra.mxu1 %v219_v43 }
  0xee   :  { %v208_v49 = vadd.f32 %v401_v48, %v90_v46  ;;  %v199_v50 = vpop.f32.mrb[7].mxu0  ;;  %404 = vmatprep.subr.bf16.mxu1 %v460_v21  ;;  %v217_v52 = vmax.f32 %v205_v44, 0.0 }
  0xef   :  { %v200_v51 = vadd.f32 %v199_v50, %v80_v34  ;;  %v215_v54 = vmax.f32 %v197_v47, 0.0 }
  0xf0   :  { %v218_v53 = vmax.f32 %v208_v49, 0.0 }
  0xf1   :  { %v216_v55 = vmax.f32 %v200_v51, 0.0  ;;  %405 = vmatpush3.bf16.msra.mxu1 %v220_v40 }
  0xf2   :  { %v222_v56 = vpack.c.bf16 %v218_v53, %v217_v52  ;;  %406 = vmatprep.subr.bf16.mxu1 %v460_v21 }
  0xf3   :  { %v221_v57 = vpack.c.bf16 %v216_v55, %v215_v54 }
  0xf5   :  { %407 = vmatpush3.bf16.msra.mxu1 %v221_v57 }
  0xf6   :  { %408 = vmatprep.subr.bf16.mxu1 %v460_v21 }
  0xf9   :  { %409 = vmatpush3.bf16.msra.mxu1 %v222_v56 }
  0xfa   :  { %414 = vmatprep.subr.bf16.mxu1 %v460_v21 }
  0xfc   :  { %411 = vmatmul.mubr.msk.bf16.vlgmr.msra.gmra.mrb[0].mxu1 %vm242_vm3, %v434_v58 }
  0xfd   :  { %416 = vmatprep.mubr.msk.bf16.mxu1 %vm461_vm2, %v460_v21 }
 0x1cf   :  { %v280_v60 = vpop.f32.mrb[0].mxu1 }
 0x1d0   :  { %v281_v61 = vadd.f32 %v280_v60, %v230_v59  ;;  %v412_v62 = vpop.f32.mrb[1].mxu1 }
 0x1d1   :  { %v283_v0 = vpop.f32.mrb[2].mxu1 }
 0x1d2   :  { %v284_v1 = vadd.f32 %v283_v0, %v235_v63  ;;  %v413_v2 = vpop.f32.mrb[3].mxu1  ;;  %v287_v3 = vmax.f32 %v281_v61, 0.0 }
 0x1d4   :  { %v288_v4 = vmax.f32 %v284_v1, 0.0 }
 0x1d6   :  { %v289_v5 = vpack.c.bf16 %v288_v4, %v287_v3 }
 0x1d8   :  { %415 = vmatpush3.bf16.msra.mxu1 %v289_v5 }
 0x1db   :  { %417 = vmatmul.mubr.msk.bf16.vlgmr.msra.gmra.mrb[4].mxu1 %vm301_vm4, %v290_v6 }
 0x2ae   :  { %v339_v12 = vpop.f32.mrb[4].mxu1 }
 0x2af   :  { %v340_v13 = vadd.f32 %v339_v12, %v300_v11  ;;  %v418_v14 = vpop.f32.mrb[5].mxu1 }
 0x2b0   :  { %v342_v15 = vpop.f32.mrb[6].mxu1 }
 0x2b1   :  { %345 = vst [vmem:[#allocation3] sm:$0x1] %v340_v13  ;;  %v419_v16 = vpop.f32.mrb[7].mxu1 }
 0x2b2   :  { %446 = shalt.err (!%p443_p4)
}
 0x2b3   :  { %s447_s15 = scalar_lea.hbm %s588_s7, 16 }
 0x2b4   :  { %p448_p5 = scmp.ne.s32.totalorder %s588_s7, %s447_s15  ;;  %p451_p6 = scmp.lt.u32.totalorder %s447_s15, %s588_s7 }
 0x2b6   :  { %p453_p7 = pnand %p451_p6, %p448_p5 }
 0x2b8   :  { %456 = shalt.err (!%p453_p7)
}
 0x2b9   :  { %355 = dma.vmem_to_hbm [thread:$0]  %s353_s12, 16, %s588_s7, [#allocation4]  }
 0x2ba   :  { %457 = dma.done.wait [#allocation4], 16  }
 0x2bb   :  { %458 = vsyncadd [#allocation4], 4294967280 }
 0x2bc   :  { %359 = vsyncpa [#allocation4], 1 }

</bundles_post_ra>
